<compile_context>
chip_gen: v6e
topology: v6e:2x2x1
jax: 0.10.0
libtpu: 0.0.40
codegen_flags: <defaults>
</compile_context>

<pallas_src>
import jax
import jax.numpy as jnp
from jax.experimental import pallas as pl
from jax.experimental.pallas import tpu as pltpu

_IN = 28 * 28          # 784
_H1, _H2, _H3, _OUT = 128, 32, 16, 10
_LANE = 128            # pad all hidden / output widths to one vreg lane width


def _round_up(n, m):
    return ((n + m - 1) // m) * m


def _mlp_kernel(x_ref,
                w1_ref, b1_ref,
                w2_ref, b2_ref,
                w3_ref, b3_ref,
                w4_ref, b4_ref,
                o_ref):
    cdt = w1_ref.dtype  # matmul compute dtype (bf16 by default)
    # Layer 1: (TB, 784) @ (784, 128) + (1, 128), ReLU   (f32 accumulate)
    h = jnp.dot(x_ref[...], w1_ref[...], preferred_element_type=jnp.float32)
    h = jnp.maximum(h + b1_ref[...], 0.0)
    # Layer 2: (TB, 128) @ (128, 128) + (1, 128), ReLU   (cols >=32 are zero)
    h = jnp.dot(h.astype(cdt), w2_ref[...], preferred_element_type=jnp.float32)
    h = jnp.maximum(h + b2_ref[...], 0.0)
    # Layer 3: (TB, 128) @ (128, 128) + (1, 128), ReLU   (cols >=16 are zero)
    h = jnp.dot(h.astype(cdt), w3_ref[...], preferred_element_type=jnp.float32)
    h = jnp.maximum(h + b3_ref[...], 0.0)
    # Layer 4: (TB, 128) @ (128, 128) + (1, 128)         (cols >=10 are zero)
    o_ref[...] = (jnp.dot(h.astype(cdt), w4_ref[...],
                          preferred_element_type=jnp.float32) + b4_ref[...])


def mnist_flat_model(x, params, *, batch_tile=512, vmem_limit_bytes=None):
    """x: (B, 1, 28, 28) float32 (NCHW). Returns (B, 10) float32 logits.

    batch_tile: rows per grid step.  512 is safe everywhere; v6e/v7x can use
    2048 (raise vmem_limit_bytes only for much larger tiles).
    """
    B = x.shape[0]
    (w1, b1), (w2, b2), (w3, b3), (w4, b4) = params
    compute_dtype = w1.dtype

    # Flatten NCHW -> (B, 784) row-major (same as torch .view) and cast to the
    # matmul dtype.  For peak HBM bandwidth on huge batches, stage x as bf16
    # upstream so this cast isn't a separate XLA pass over the data.
    x_flat = x.reshape(B, -1).astype(compute_dtype)

    # Batch tile: multiple of 8 (sublane granularity); never bigger than the
    # (padded) batch so tiny demo batches don't process mostly padding.
    tb = _round_up(min(batch_tile, _round_up(B, 8)), 8)
    b_pad = _round_up(B, tb)
    if b_pad != B:
        x_flat = jnp.pad(x_flat, ((0, b_pad - B), (0, 0)))

    grid = (b_pad // tb,)

    x_spec = pl.BlockSpec((tb, _IN), lambda i: (i, 0))
    out_spec = pl.BlockSpec((tb, _LANE), lambda i: (i, 0))
    # Weights / biases: constant index_map -> fetched once, VMEM-resident.
    w1_spec = pl.BlockSpec((_IN, _LANE), lambda i: (0, 0))
    wk_spec = pl.BlockSpec((_LANE, _LANE), lambda i: (0, 0))
    b_spec = pl.BlockSpec((1, _LANE), lambda i: (0, 0))

    flops = 2 * b_pad * (_IN * _LANE + 3 * _LANE * _LANE)
    bytes_accessed = (
        x_flat.size * x_flat.dtype.itemsize
        + sum(w.size * w.dtype.itemsize + b.size * b.dtype.itemsize
              for (w, b) in params)
        + b_pad * _LANE * 4)

    out_padded = pl.pallas_call(
        _mlp_kernel,
        out_shape=jax.ShapeDtypeStruct((b_pad, _LANE), jnp.float32),
        grid=grid,
        in_specs=[x_spec,
                  w1_spec, b_spec,
                  wk_spec, b_spec,
                  wk_spec, b_spec,
                  wk_spec, b_spec],
        out_specs=out_spec,
        compiler_params=pltpu.CompilerParams(
            dimension_semantics=("parallel",),
            vmem_limit_bytes=vmem_limit_bytes),
        cost_estimate=pl.CostEstimate(
            flops=flops, transcendentals=0, bytes_accessed=bytes_accessed),
    )(x_flat, w1, b1, w2, b2, w3, b3, w4, b4)

    return out_padded[:B, :_OUT]


def init_params(key, compute_dtype=jnp.bfloat16):
    """Torch-nn.Linear-style fan_in uniform init, stored pre-transposed
    ((in_features, out_features)) and zero-padded to a 128-lane width.
    Weights are in `compute_dtype`; biases stay float32 (bias+ReLU run in f32).
    """
    dims = [(_IN, _H1), (_H1, _H2), (_H2, _H3), (_H3, _OUT)]
    padded_in = [_IN, _LANE, _LANE, _LANE]
    params = []
    for (fan_in, fan_out), pad_in in zip(dims, padded_in):
        key, kw, kb = jax.random.split(key, 3)
        bound = 1.0 / float(fan_in) ** 0.5
        w = jax.random.uniform(kw, (fan_in, fan_out), jnp.float32,
                               minval=-bound, maxval=bound)
        b = jax.random.uniform(kb, (fan_out,), jnp.float32,
                               minval=-bound, maxval=bound)
        w_pad = jnp.zeros((pad_in, _LANE), jnp.float32)
        w_pad = w_pad.at[:fan_in, :fan_out].set(w)
        b_pad = jnp.zeros((1, _LANE), jnp.float32)
        b_pad = b_pad.at[0, :fan_out].set(b)
        params.append((w_pad.astype(compute_dtype), b_pad))
    return params


def _reference(x, params):
    """Pure-JAX reference mimicking the kernel's dtype behaviour."""
    (w1, b1), (w2, b2), (w3, b3), (w4, b4) = params
    cdt = w1.dtype
    h = x.reshape(x.shape[0], -1).astype(cdt)
    h = jnp.maximum(jnp.dot(h, w1, preferred_element_type=jnp.float32) + b1, 0.0)
    h = jnp.maximum(jnp.dot(h.astype(cdt), w2,
                            preferred_element_type=jnp.float32) + b2, 0.0)
    h = jnp.maximum(jnp.dot(h.astype(cdt), w3,
                            preferred_element_type=jnp.float32) + b3, 0.0)
    out = jnp.dot(h.astype(cdt), w4, preferred_element_type=jnp.float32) + b4
    return out[:, :_OUT]


if __name__ == "__main__":
    key = jax.random.PRNGKey(0)
    key, kx = jax.random.split(key)

    # MNIST-shaped input (NCHW), small batch.
    x = jax.random.normal(kx, (2, 1, 28, 28), jnp.float32)
    params = init_params(key)

    out = mnist_flat_model(x, params)
    out = jax.block_until_ready(out)
    assert out.shape == (2, 10)

    ref = _reference(x, params)
    assert jnp.allclose(out, ref, atol=1e-3, rtol=1e-3), "mismatch vs reference"

    print("KERNEL_OK")
</pallas_src>

<mosaic_0001>
module attributes {stable_mosaic.version = 11 : i64} {
  func.func @_mlp_kernel(%arg0: i32, %arg1: memref<8x784xbf16, #tpu.memory_space<vmem>>, %arg2: memref<784x128xbf16, #tpu.memory_space<vmem>>, %arg3: memref<1x128xf32, #tpu.memory_space<vmem>>, %arg4: memref<128x128xbf16, #tpu.memory_space<vmem>>, %arg5: memref<1x128xf32, #tpu.memory_space<vmem>>, %arg6: memref<128x128xbf16, #tpu.memory_space<vmem>>, %arg7: memref<1x128xf32, #tpu.memory_space<vmem>>, %arg8: memref<128x128xbf16, #tpu.memory_space<vmem>>, %arg9: memref<1x128xf32, #tpu.memory_space<vmem>>, %arg10: memref<8x128xf32, #tpu.memory_space<vmem>>) attributes {dimension_semantics = [#tpu.dimension_semantics<parallel>], iteration_bounds = array<i64: 1>, scalar_prefetch = 0 : i64, scratch_operands = 0 : i64, tpu.core_type = #tpu.core_type<tc>, window_params = [{transform_indices = @transform_0, window_bounds = array<i64: 8, 784>}, {pipeline_mode = #tpu.pipeline_mode<synchronous>, transform_indices = @transform_1, window_bounds = array<i64: 784, 128>}, {pipeline_mode = #tpu.pipeline_mode<synchronous>, transform_indices = @transform_2, window_bounds = array<i64: 1, 128>}, {pipeline_mode = #tpu.pipeline_mode<synchronous>, transform_indices = @transform_3, window_bounds = array<i64: 128, 128>}, {pipeline_mode = #tpu.pipeline_mode<synchronous>, transform_indices = @transform_4, window_bounds = array<i64: 1, 128>}, {pipeline_mode = #tpu.pipeline_mode<synchronous>, transform_indices = @transform_5, window_bounds = array<i64: 128, 128>}, {pipeline_mode = #tpu.pipeline_mode<synchronous>, transform_indices = @transform_6, window_bounds = array<i64: 1, 128>}, {pipeline_mode = #tpu.pipeline_mode<synchronous>, transform_indices = @transform_7, window_bounds = array<i64: 128, 128>}, {pipeline_mode = #tpu.pipeline_mode<synchronous>, transform_indices = @transform_8, window_bounds = array<i64: 1, 128>}, {transform_indices = @transform_9, window_bounds = array<i64: 8, 128>}]} {
    %c0 = arith.constant 0 : index
    %c0_0 = arith.constant 0 : index
    %0 = vector.load %arg1[%c0, %c0_0] : memref<8x784xbf16, #tpu.memory_space<vmem>>, vector<8x784xbf16>
    %c0_1 = arith.constant 0 : index
    %c0_2 = arith.constant 0 : index
    %1 = vector.load %arg2[%c0_1, %c0_2] : memref<784x128xbf16, #tpu.memory_space<vmem>>, vector<784x128xbf16>
    %cst = arith.constant dense<0.000000e+00> : vector<8x128xf32>
    %2 = tpu.matmul %0, %1, %cst {dimension_numbers = #tpu.dot_dimension_numbers<[1], [0], [0], [1], [0, 0, 1, 1], [], []>} : vector<8x784xbf16>, vector<784x128xbf16>, vector<8x128xf32> -> vector<8x128xf32>
    %c0_3 = arith.constant 0 : index
    %c0_4 = arith.constant 0 : index
    %3 = vector.load %arg3[%c0_3, %c0_4] : memref<1x128xf32, #tpu.memory_space<vmem>>, vector<1x128xf32>
    %4 = vector.broadcast %3 : vector<1x128xf32> to vector<8x128xf32>
    %5 = arith.addf %2, %4 : vector<8x128xf32>
    %cst_5 = arith.constant 0.000000e+00 : f32
    %6 = vector.broadcast %cst_5 : f32 to vector<8x128xf32>
    %7 = arith.maximumf %5, %6 : vector<8x128xf32>
    %8 = arith.truncf %7 : vector<8x128xf32> to vector<8x128xbf16>
    %c0_6 = arith.constant 0 : index
    %c0_7 = arith.constant 0 : index
    %9 = vector.load %arg4[%c0_6, %c0_7] : memref<128x128xbf16, #tpu.memory_space<vmem>>, vector<128x128xbf16>
    %cst_8 = arith.constant dense<0.000000e+00> : vector<8x128xf32>
    %10 = tpu.matmul %8, %9, %cst_8 {dimension_numbers = #tpu.dot_dimension_numbers<[1], [0], [0], [1], [0, 0, 1, 1], [], []>} : vector<8x128xbf16>, vector<128x128xbf16>, vector<8x128xf32> -> vector<8x128xf32>
    %c0_9 = arith.constant 0 : index
    %c0_10 = arith.constant 0 : index
    %11 = vector.load %arg5[%c0_9, %c0_10] : memref<1x128xf32, #tpu.memory_space<vmem>>, vector<1x128xf32>
    %12 = vector.broadcast %11 : vector<1x128xf32> to vector<8x128xf32>
    %13 = arith.addf %10, %12 : vector<8x128xf32>
    %cst_11 = arith.constant 0.000000e+00 : f32
    %14 = vector.broadcast %cst_11 : f32 to vector<8x128xf32>
    %15 = arith.maximumf %13, %14 : vector<8x128xf32>
    %16 = arith.truncf %15 : vector<8x128xf32> to vector<8x128xbf16>
    %c0_12 = arith.constant 0 : index
    %c0_13 = arith.constant 0 : index
    %17 = vector.load %arg6[%c0_12, %c0_13] : memref<128x128xbf16, #tpu.memory_space<vmem>>, vector<128x128xbf16>
    %cst_14 = arith.constant dense<0.000000e+00> : vector<8x128xf32>
    %18 = tpu.matmul %16, %17, %cst_14 {dimension_numbers = #tpu.dot_dimension_numbers<[1], [0], [0], [1], [0, 0, 1, 1], [], []>} : vector<8x128xbf16>, vector<128x128xbf16>, vector<8x128xf32> -> vector<8x128xf32>
    %c0_15 = arith.constant 0 : index
    %c0_16 = arith.constant 0 : index
    %19 = vector.load %arg7[%c0_15, %c0_16] : memref<1x128xf32, #tpu.memory_space<vmem>>, vector<1x128xf32>
    %20 = vector.broadcast %19 : vector<1x128xf32> to vector<8x128xf32>
    %21 = arith.addf %18, %20 : vector<8x128xf32>
    %cst_17 = arith.constant 0.000000e+00 : f32
    %22 = vector.broadcast %cst_17 : f32 to vector<8x128xf32>
    %23 = arith.maximumf %21, %22 : vector<8x128xf32>
    %24 = arith.truncf %23 : vector<8x128xf32> to vector<8x128xbf16>
    %c0_18 = arith.constant 0 : index
    %c0_19 = arith.constant 0 : index
    %25 = vector.load %arg8[%c0_18, %c0_19] : memref<128x128xbf16, #tpu.memory_space<vmem>>, vector<128x128xbf16>
    %cst_20 = arith.constant dense<0.000000e+00> : vector<8x128xf32>
    %26 = tpu.matmul %24, %25, %cst_20 {dimension_numbers = #tpu.dot_dimension_numbers<[1], [0], [0], [1], [0, 0, 1, 1], [], []>} : vector<8x128xbf16>, vector<128x128xbf16>, vector<8x128xf32> -> vector<8x128xf32>
    %c0_21 = arith.constant 0 : index
    %c0_22 = arith.constant 0 : index
    %27 = vector.load %arg9[%c0_21, %c0_22] : memref<1x128xf32, #tpu.memory_space<vmem>>, vector<1x128xf32>
    %28 = vector.broadcast %27 : vector<1x128xf32> to vector<8x128xf32>
    %29 = arith.addf %26, %28 : vector<8x128xf32>
    %c0_23 = arith.constant 0 : index
    %c0_24 = arith.constant 0 : index
    %30 = vector.load %arg10[%c0_23, %c0_24] : memref<8x128xf32, #tpu.memory_space<vmem>>, vector<8x128xf32>
    tpu.vector_store %arg10[%c0_23, %c0_24], %29 {strides = array<i32>} : memref<8x128xf32, #tpu.memory_space<vmem>>, vector<8x128xf32>,
    return
  }
  func.func @transform_0(%arg0: i32) -> (i32, i32) {
    %c0_i32 = arith.constant 0 : i32
    %c0_i32_0 = arith.constant 0 : i32
    return %arg0, %c0_i32 : i32, i32
  }
  func.func @transform_1(%arg0: i32) -> (i32, i32) {
    %c0_i32 = arith.constant 0 : i32
    %c0_i32_0 = arith.constant 0 : i32
    %c0_i32_1 = arith.constant 0 : i32
    return %c0_i32, %c0_i32_0 : i32, i32
  }
  func.func @transform_2(%arg0: i32) -> (i32, i32) {
    %c0_i32 = arith.constant 0 : i32
    %c0_i32_0 = arith.constant 0 : i32
    %c0_i32_1 = arith.constant 0 : i32
    return %c0_i32, %c0_i32_0 : i32, i32
  }
  func.func @transform_3(%arg0: i32) -> (i32, i32) {
    %c0_i32 = arith.constant 0 : i32
    %c0_i32_0 = arith.constant 0 : i32
    %c0_i32_1 = arith.constant 0 : i32
    return %c0_i32, %c0_i32_0 : i32, i32
  }
  func.func @transform_4(%arg0: i32) -> (i32, i32) {
    %c0_i32 = arith.constant 0 : i32
    %c0_i32_0 = arith.constant 0 : i32
    %c0_i32_1 = arith.constant 0 : i32
    return %c0_i32, %c0_i32_0 : i32, i32
  }
  func.func @transform_5(%arg0: i32) -> (i32, i32) {
    %c0_i32 = arith.constant 0 : i32
    %c0_i32_0 = arith.constant 0 : i32
    %c0_i32_1 = arith.constant 0 : i32
    return %c0_i32, %c0_i32_0 : i32, i32
  }
  func.func @transform_6(%arg0: i32) -> (i32, i32) {
    %c0_i32 = arith.constant 0 : i32
    %c0_i32_0 = arith.constant 0 : i32
    %c0_i32_1 = arith.constant 0 : i32
    return %c0_i32, %c0_i32_0 : i32, i32
  }
  func.func @transform_7(%arg0: i32) -> (i32, i32) {
    %c0_i32 = arith.constant 0 : i32
    %c0_i32_0 = arith.constant 0 : i32
    %c0_i32_1 = arith.constant 0 : i32
    return %c0_i32, %c0_i32_0 : i32, i32
  }
  func.func @transform_8(%arg0: i32) -> (i32, i32) {
    %c0_i32 = arith.constant 0 : i32
    %c0_i32_0 = arith.constant 0 : i32
    %c0_i32_1 = arith.constant 0 : i32
    return %c0_i32, %c0_i32_0 : i32, i32
  }
  func.func @transform_9(%arg0: i32) -> (i32, i32) {
    %c0_i32 = arith.constant 0 : i32
    %c0_i32_0 = arith.constant 0 : i32
    return %arg0, %c0_i32 : i32, i32
  }
}

</mosaic_0001>

<bundles_post_ra>
// kernel: tpu_custom_call.1
= control target key start
LH: loop header
LB: loop body
LE: loop exit
PB: predicated region body
PF: predicated region fallthrough
CT: control target
= control target key end

     0   :  { %14 = vsyncpa [#allocation3], 0  ;;  %s1647_s0 = inlined_call_operand.hbm [shape: bf16[8,784], index: 0, kind: input, shape index: {}]   ;;  %s1648_s1 = inlined_call_operand.hbm [shape: bf16[784,128], index: 1, kind: input, shape index: {}]   ;;  %s1649_s2 = inlined_call_operand.vmem [shape: f32[1,128], index: 2, kind: input, shape index: {}]   ;;  %s1650_s3 = inlined_call_operand.hbm [shape: bf16[128,128], index: 3, kind: input, shape index: {}]   ;;  %s1651_s4 = inlined_call_operand.vmem [shape: f32[1,128], index: 4, kind: input, shape index: {}]   ;;  %s1652_s5 = inlined_call_operand.hbm [shape: bf16[128,128], index: 5, kind: input, shape index: {}]   ;;  %s1653_s6 = inlined_call_operand.vmem [shape: f32[1,128], index: 6, kind: input, shape index: {}]   ;;  %s1654_s7 = inlined_call_operand.hbm [shape: bf16[128,128], index: 7, kind: input, shape index: {}]   ;;  %s1655_s8 = inlined_call_operand.vmem [shape: f32[1,128], index: 8, kind: input, shape index: {}]   ;;  %s1656_s9 = inlined_call_operand.hbm [shape: f32[8,128], index: 9, kind: output, shape index: {}]  }
   0x1   :  { %15 = vsyncpa [#allocation6], 0 }
   0x2   :  { %16 = vsyncpa [#allocation9], 0 }
   0x3   :  { %17 = vsyncpa [#allocation4], 0  ;;  %s1512_s30 = smov [#allocation5]  }
   0x4   :  { %s33_s10 = sshll.u32 %s1512_s30, 4  ;;  %s34_s10 = int_to_ptr.vmem [resolvable:$true] %s33_s10 }
   0x5   :  { %s1392_s11 = scalar_lea.vmem %s34_s10, 6272  ;;  %p1397_p1 = scmp.lt.s32.totalorder %s34_s10, %s34_s10 }
   0x6   :  { %p1393_p0 = scmp.ne.s32.totalorder %s34_s10, %s1392_s11  ;;  %p1398_p2 = scmp.lt.s32.totalorder %s1392_s11, %s1392_s11 }
   0x8   :  { %p1399_p3 = por %p1398_p2, %p1397_p1 }
   0xa   :  { %p1400_p4 = pnand %p1399_p3, %p1393_p0 }
   0xc   :  { %1403 = shalt.err (!%p1400_p4)
}
   0xd   :  { %s1513_s12 = smov 64   ;;  %s1514_s13 = smov 4  }
   0xe   :  { %39 = dma.hbm_to_vmem [thread:$0]  %s1648_s1, 6272, %s34_s10, [#allocation6], %s1513_s12, %s1513_s12, %s1514_s13  }
   0xf   :  { %s1515_s16 = smov [#allocation8]   ;;  %s1516_s18 = smov [#allocation2]  }
  0x10   :  { %s61_s17 = sshll.u32 %s1515_s16, 4  ;;  %s24_s19 = sshll.u32 %s1516_s18, 4  ;;  %s62_s17 = int_to_ptr.vmem [resolvable:$true] %s61_s17  ;;  %s25_s19 = int_to_ptr.vmem [resolvable:$true] %s24_s19 }
  0x11   :  { %s1412_s20 = scalar_lea.vmem %s62_s17, 1024  ;;  %p1417_p6 = scmp.lt.s32.totalorder %s62_s17, %s62_s17 }
  0x12   :  { %p1413_p5 = scmp.ne.s32.totalorder %s62_s17, %s1412_s20  ;;  %p1418_p7 = scmp.lt.s32.totalorder %s1412_s20, %s1412_s20 }
  0x14   :  { %p1419_p8 = por %p1418_p7, %p1417_p6 }
  0x16   :  { %p1420_p9 = pnand %p1419_p8, %p1413_p5 }
  0x18   :  { %1423 = shalt.err (!%p1420_p9)
}
  0x19   :  { %67 = dma.hbm_to_vmem [thread:$0]  %s1652_s5, 1024, %s62_s17, [#allocation9], %s1513_s12, %s1513_s12, %s1514_s13  }
  0x1a   :  { %s1432_s1 = scalar_lea.vmem %s25_s19, 448  ;;  %p1437_p11 = scmp.lt.s32.totalorder %s25_s19, %s25_s19 }
  0x1b   :  { %p1433_p10 = scmp.ne.s32.totalorder %s25_s19, %s1432_s1  ;;  %p1438_p12 = scmp.lt.s32.totalorder %s1432_s1, %s1432_s1 }
  0x1d   :  { %p1439_p13 = por %p1438_p12, %p1437_p11 }
  0x1f   :  { %p1440_p0 = pnand %p1439_p13, %p1433_p10 }
  0x21   :  { %1443 = shalt.err (!%p1440_p0)
}
  0x22   :  { %27 = dma.hbm_to_vmem [thread:$0]  %s1647_s0, 448, %s25_s19, [#allocation3]  }
  0x23   :  { %s1517_s25 = smov [#allocation7]   ;;  %s1518_s27 = smov [#allocation10]  }
  0x24   :  { %s47_s26 = sshll.u32 %s1517_s25, 4  ;;  %s75_s28 = sshll.u32 %s1518_s27, 4  ;;  %s48_s26 = int_to_ptr.vmem [resolvable:$true] %s47_s26  ;;  %s76_s28 = int_to_ptr.vmem [resolvable:$true] %s75_s28 }
  0x25   :  { %s1452_s29 = scalar_lea.vmem %s48_s26, 1024  ;;  %p1457_p2 = scmp.lt.s32.totalorder %s48_s26, %s48_s26 }
  0x26   :  { %p1453_p1 = scmp.ne.s32.totalorder %s48_s26, %s1452_s29  ;;  %p1458_p3 = scmp.lt.s32.totalorder %s1452_s29, %s1452_s29 }
  0x28   :  { %p1459_p4 = por %p1458_p3, %p1457_p2 }
  0x2a   :  { %p1460_p5 = pnand %p1459_p4, %p1453_p1 }
  0x2c   :  { %1463 = shalt.err (!%p1460_p5)
}
  0x2d   :  { %53 = dma.hbm_to_vmem [thread:$0]  %s1650_s3, 1024, %s48_s26, [#allocation6], %s1513_s12, %s1513_s12, %s1514_s13  }
  0x2e   :  { %s1472_s0 = scalar_lea.vmem %s76_s28, 1024  ;;  %p1477_p7 = scmp.lt.s32.totalorder %s76_s28, %s76_s28 }
  0x2f   :  { %p1473_p6 = scmp.ne.s32.totalorder %s76_s28, %s1472_s0  ;;  %p1478_p8 = scmp.lt.s32.totalorder %s1472_s0, %s1472_s0 }
  0x31   :  { %p1479_p9 = por %p1478_p8, %p1477_p7 }
  0x33   :  { %p1480_p10 = pnand %p1479_p9, %p1473_p6 }
  0x35   :  { %1483 = shalt.err (!%p1480_p10)
}
  0x36   :  { %81 = dma.hbm_to_vmem [thread:$0]  %s1654_s7, 1024, %s76_s28, [#allocation9], %s1513_s12, %s1513_s12, %s1514_s13  }
  0x37   :  { %1504 = dma.done.wait [#allocation3], 448  }
  0x38   :  { %1505 = vsyncadd [#allocation3], 4294966848 }
  0x39   :  { %1506 = dma.done.wait [#allocation6], 7296  }
  0x3a   :  { %1507 = vsyncadd [#allocation6], 4294960000 }
  0x3b   :  { %1508 = dma.done.wait [#allocation9], 2048  }
  0x3c   :  { %1509 = vsyncadd [#allocation9], 4294965248  ;;  %v1304_v0 = vld [vmem:[#allocation5 + $0x78] sm:$0xff]   ;;  %v1308_v4 = vld [vmem:[#allocation5 + $0x70] sm:$0xff]   ;;  %v1519_v43 = vmov 0.0   ;;  %vm1520_vm0 = vmmov 0  }
  0x3d   :  { %v1305_v1 = vld [vmem:[#allocation5 + $0x38] sm:$0xff]   ;;  %1133 = vmatprep.subr.bf16.mxu0 %v1304_v0  ;;  %v1309_v5 = vld [vmem:[#allocation5 + $0x30] sm:$0xff]   ;;  %v1312_v8 = vld [vmem:[#allocation5 + $0x68] sm:$0xff]   ;;  %vm527_vm1 = vcmask 130048   ;;  %s1521_s16 = smov [#allocation11]  }
  0x3e   :  { %v1306_v2 = vld [vmem:[#allocation5 + $0xf8] sm:$0xff]   ;;  %1134 = vmatpush3.bf16.msra.mxu0 %v1305_v1  ;;  %v1310_v6 = vld [vmem:[#allocation5 + $0xf0] sm:$0xff]   ;;  %v1313_v9 = vld [vmem:[#allocation5 + $0x28] sm:$0xff]   ;;  %s1037_s17 = sshll.u32 %s1521_s16, 4  ;;  %s1038_s17 = int_to_ptr.vmem [resolvable:$true] %s1037_s17 }
  0x3f   :  { %v1307_v3 = vld [vmem:[#allocation5 + $0xb8] sm:$0xff]   ;;  %1155 = vmatprep.subr.bf16.mxu1 %v1306_v2  ;;  %1135 = vmatprep.subr.bf16.mxu0 %v1308_v4  ;;  %v1311_v7 = vld [vmem:[#allocation5 + $0xb0] sm:$0xff]   ;;  %v1314_v10 = vld [vmem:[#allocation5 + $0xe8] sm:$0xff]   ;;  %p1489_p12 = scmp.lt.s32.totalorder %s1038_s17, %s1038_s17 }
  0x40   :  { %1156 = vmatpush3.bf16.msra.mxu1 %v1307_v3  ;;  %v1315_v11 = vld [vmem:[#allocation5 + $0xa8] sm:$0xff]   ;;  %v1316_v12 = vld [vmem:[#allocation5 + $0x60] sm:$0xff]   ;;  %v1320_v16 = vld [vmem:[#allocation5 + $0x58] sm:$0xff]  }
  0x41   :  { %1157 = vmatprep.subr.bf16.mxu1 %v1310_v6  ;;  %v1317_v13 = vld [vmem:[#allocation5 + $0x20] sm:$0xff]   ;;  %v1321_v17 = vld [vmem:[#allocation5 + $0x18] sm:$0xff]   ;;  %v1324_v20 = vld [vmem:[#allocation5 + $0x50] sm:$0xff]  }
  0x42   :  { %1136 = vmatpush3.bf16.msra.mxu0 %v1309_v5  ;;  %v1318_v14 = vld [vmem:[#allocation5 + $0xe0] sm:$0xff]   ;;  %v1322_v18 = vld [vmem:[#allocation5 + $0xd8] sm:$0xff]   ;;  %v1325_v21 = vld [vmem:[#allocation5 + $0x10] sm:$0xff]  }
  0x43   :  { %1137 = vmatprep.subr.bf16.mxu0 %v1312_v8  ;;  %v1319_v15 = vld [vmem:[#allocation5 + $0xa0] sm:$0xff]   ;;  %v1323_v19 = vld [vmem:[#allocation5 + $0x98] sm:$0xff]   ;;  %v1326_v22 = vld [vmem:[#allocation5 + $0xd0] sm:$0xff]  }
  0x44   :  { %1158 = vmatpush3.bf16.msra.mxu1 %v1311_v7  ;;  %v1327_v23 = vld [vmem:[#allocation5 + $0x90] sm:$0xff]   ;;  %v1328_v24 = vld [vmem:[#allocation5 + $0x48] sm:$0xff]   ;;  %v1332_v28 = vld [vmem:[#allocation5 + $0x40] sm:$0xff]  }
  0x45   :  { %1159 = vmatprep.subr.bf16.mxu1 %v1314_v10  ;;  %v1329_v25 = vld [vmem:[#allocation5 + $0x8] sm:$0xff]   ;;  %v1333_v29 = vld [vmem:[#allocation5] sm:$0xff]   ;;  %v1338_v35 = vld [vmem:[#allocation5 + $0x178] sm:$0xff]  }
  0x46   :  { %1138 = vmatpush3.bf16.msra.mxu0 %v1313_v9  ;;  %v1330_v26 = vld [vmem:[#allocation5 + $0xc8] sm:$0xff]   ;;  %v1334_v30 = vld [vmem:[#allocation5 + $0xc0] sm:$0xff]   ;;  %v1341_v39 = vld [vmem:[#allocation5 + $0x138] sm:$0xff]  }
  0x47   :  { %1139 = vmatprep.subr.bf16.mxu0 %v1316_v12  ;;  %v1331_v27 = vld [vmem:[#allocation5 + $0x88] sm:$0xff]   ;;  %v1337_v34 = vld [vmem:[#allocation5 + $0x80] sm:$0xff]   ;;  %v1342_v40 = vld [vmem:[#allocation5 + $0x170] sm:$0xff]  }
  0x48   :  { %1160 = vmatpush3.bf16.msra.mxu1 %v1315_v11  ;;  %v100_v31 = vld [vmem:[#allocation2] sm:$0xff]  ;;  %v101_v36 = vld [vmem:[#allocation2 + $0x8] sm:$0xff]  ;;  %v1348_v47 = vld [vmem:[#allocation5 + $0x158] sm:$0xff]  }
  0x49   :  { %1161 = vmatprep.subr.bf16.mxu1 %v1318_v14  ;;  %v1049_v32 = vcombine.low %v100_v31, %v100_v31  ;;  %v1050_v33 = vcombine.high %v100_v31, %v100_v31  ;;  %v1051_v37 = vcombine.low %v101_v36, %v101_v36  ;;  %v1052_v38 = vcombine.high %v101_v36, %v101_v36  ;;  %v1343_v41 = vld [vmem:[#allocation5 + $0x130] sm:$0xff]   ;;  %v1344_v42 = vld [vmem:[#allocation5 + $0x168] sm:$0xff]   ;;  %v1346_v45 = vld [vmem:[#allocation5 + $0x160] sm:$0xff]  }
  0x4a   :  { %1140 = vmatpush3.bf16.msra.mxu0 %v1317_v13  ;;  %v1345_v44 = vld [vmem:[#allocation5 + $0x128] sm:$0xff]   ;;  %v1347_v46 = vld [vmem:[#allocation5 + $0x120] sm:$0xff]   ;;  %v1349_v48 = vld [vmem:[#allocation5 + $0x118] sm:$0xff]  }
  0x4b   :  { %1141 = vmatprep.subr.bf16.mxu0 %v1320_v16  ;;  %563 = vmatprep.mubr.bf16.mxu0 %v1050_v33  ;;  %v1350_v49 = vld [vmem:[#allocation5 + $0x150] sm:$0xff]   ;;  %v1356_v50 = vld [vmem:[#allocation5 + $0x180] sm:$0xff]   ;;  %v1359_v54 = vld [vmem:[#allocation2 + $0x18] ss:$0 sps:$4 sm:$0xff]  }
  0x4c   :  { %1162 = vmatpush3.bf16.msra.mxu1 %v1319_v15  ;;  %603 = vmatprep.mubr.bf16.mxu1 %v1052_v38  ;;  %v102_v51 = vld [vmem:[#allocation2 + $0x10] sm:$0xff]  ;;  %v1352_v55 = vld [vmem:[#allocation5 + $0x148] sm:$0xff]   ;;  %v1354_v57 = vld [vmem:[#allocation5 + $0x140] sm:$0xff]  }
  0x4d   :  { %1163 = vmatprep.subr.bf16.mxu1 %v1322_v18  ;;  %v1351_v52 = vld [vmem:[#allocation5 + $0x110] sm:$0xff]   ;;  %v1054_v53 = vcombine.high %v102_v51, %v102_v51  ;;  %v1353_v56 = vld [vmem:[#allocation5 + $0x108] sm:$0xff]   ;;  %v1355_v58 = vld [vmem:[#allocation5 + $0x100] sm:$0xff]   ;;  %v1053_v59 = vcombine.low %v102_v51, %v102_v51 }
  0x4e   :  { %1142 = vmatpush3.bf16.msra.mxu0 %v1321_v17  ;;  %v1360_v60 = vld [vmem:[#allocation7 + $0x38] sm:$0xff]   ;;  %v1361_v61 = vld [vmem:[#allocation7 + $0x30] sm:$0xff]   ;;  %v1362_v62 = vld [vmem:[#allocation7 + $0x28] sm:$0xff]  }
  0x4f   :  { %1143 = vmatprep.subr.bf16.mxu0 %v1324_v20  ;;  %v1363_v63 = vld [vmem:[#allocation7 + $0x20] sm:$0xff]   ;;  %v1364_v0 = vld [vmem:[#allocation7 + $0x18] sm:$0xff]   ;;  %v1365_v1 = vld [vmem:[#allocation7 + $0x10] sm:$0xff]  }
  0x50   :  { %1164 = vmatpush3.bf16.msra.mxu1 %v1323_v19  ;;  %v1366_v2 = vld [vmem:[#allocation7 + $0x8] sm:$0xff]   ;;  %v1367_v3 = vld [vmem:[#allocation7] sm:$0xff]   ;;  %v1368_v4 = vld [vmem:[#allocation8 + $0x38] sm:$0xff]  }
  0x51   :  { %1165 = vmatprep.subr.bf16.mxu1 %v1326_v22  ;;  %v1369_v5 = vld [vmem:[#allocation8 + $0x30] sm:$0xff]   ;;  %v1370_v6 = vld [vmem:[#allocation8 + $0x28] sm:$0xff]   ;;  %v1371_v7 = vld [vmem:[#allocation8 + $0x20] sm:$0xff]  }
  0x52   :  { %1144 = vmatpush3.bf16.msra.mxu0 %v1325_v21  ;;  %v1372_v8 = vld [vmem:[#allocation8 + $0x18] sm:$0xff]   ;;  %v1373_v9 = vld [vmem:[#allocation8 + $0x10] sm:$0xff]   ;;  %v1374_v36 = vld [vmem:[#allocation8 + $0x8] sm:$0xff]  }
  0x53   :  { %1145 = vmatprep.subr.bf16.mxu0 %v1328_v24  ;;  %v1376_v38 = vld [vmem:[#allocation10 + $0x38] sm:$0xff]  }
  0x54   :  { %1166 = vmatpush3.bf16.msra.mxu1 %v1327_v23  ;;  %v1048_v23 = vld [vmem:[%s1649_s2] ss:$0 sm:$0xff] }
  0x55   :  { %1167 = vmatprep.subr.bf16.mxu1 %v1330_v26 }
  0x56   :  { %1146 = vmatpush3.bf16.msra.mxu0 %v1329_v25 }
  0x57   :  { %1147 = vmatprep.subr.bf16.mxu0 %v1332_v28 }
  0x58   :  { %1168 = vmatpush3.bf16.msra.mxu1 %v1331_v27 }
  0x59   :  { %1169 = vmatprep.subr.bf16.mxu1 %v1334_v30 }
  0x5a   :  { %1148 = vmatpush3.bf16.msra.mxu0 %v1333_v29 }
  0x5b   :  { %1177 = vmatprep.subr.bf16.mxu0 %v1338_v35 }
  0x5c   :  { %1170 = vmatpush3.bf16.msra.mxu1 %v1337_v34 }
  0x5d   :  { %564 = vmatmul.mubr.bf16.vlgmr.msra.gmra.mxu0 %v1049_v32  ;;  %1228 = vmatprep.subr.bf16.mxu1 %v1519_v43 }
  0x5e   :  { %1178 = vmatpush3.bf16.msra.mxu0 %v1341_v39  ;;  %643 = vmatprep.mubr.bf16.mxu0 %v1054_v53  ;;  %v1377_v39 = vld [vmem:[#allocation10 + $0x30] sm:$0xff]   ;;  %v1382_v53 = vld [vmem:[#allocation10 + $0x8] sm:$0xff]  }
  0x5f   :  { %604 = vmatmul.mubr.bf16.vlgmr.msra.gmra.mxu1 %v1051_v37  ;;  %1179 = vmatprep.subr.bf16.mxu0 %v1342_v40  ;;  %v1375_v37 = vld [vmem:[#allocation8] sm:$0xff]   ;;  %v1378_v40 = vld [vmem:[#allocation10 + $0x28] sm:$0xff]  }
  0x60   :  { %1230 = vmatprep.mubr.msk.bf16.mxu1 %vm1520_vm0, %v1519_v43  ;;  %1229 = vmatpush3.bf16.msra.mxu1 %v1356_v50 }
  0x61   :  { %1234 = vmatprep.subr.bf16.mxu1 %v1519_v43 }
  0x62   :  { %1180 = vmatpush3.bf16.msra.mxu0 %v1343_v41  ;;  %v1379_v41 = vld [vmem:[#allocation10 + $0x20] sm:$0xff]  }
  0x63   :  { %1181 = vmatprep.subr.bf16.mxu0 %v1344_v42  ;;  %v1380_v42 = vld [vmem:[#allocation10 + $0x18] sm:$0xff]  }
  0x66   :  { %1182 = vmatpush3.bf16.msra.mxu0 %v1345_v44  ;;  %v1381_v44 = vld [vmem:[#allocation10 + $0x10] sm:$0xff]  }
  0x67   :  { %1183 = vmatprep.subr.bf16.mxu0 %v1346_v45  ;;  %1231 = vmatmul.mubr.msk.bf16.vlgmr.msra.gmra.mxu1 %vm527_vm1, %v1359_v54  ;;  %v1106_v45 = vld [vmem:[%s1651_s4] ss:$0 sm:$0xff]  ;;  %v1383_v54 = vld [vmem:[#allocation10] sm:$0xff]  }
  0x68   :  { %1250 = vmatprep.mubr.msk.bf16.mxu1 %vm1520_vm0, %v1519_v43  ;;  %1235 = vmatpush3.bf16.msra.mxu1 %v1360_v60 }
  0x69   :  { %1236 = vmatprep.subr.bf16.mxu1 %v1519_v43 }
  0x6a   :  { %1184 = vmatpush3.bf16.msra.mxu0 %v1347_v46 }
  0x6b   :  { %1185 = vmatprep.subr.bf16.mxu0 %v1348_v47 }
  0x6c   :  { %1237 = vmatpush3.bf16.msra.mxu1 %v1361_v61 }
  0x6d   :  { %1238 = vmatprep.subr.bf16.mxu1 %v1519_v43 }
  0x6e   :  { %1186 = vmatpush3.bf16.msra.mxu0 %v1349_v48 }
  0x6f   :  { %1187 = vmatprep.subr.bf16.mxu0 %v1350_v49 }
  0x70   :  { %1239 = vmatpush3.bf16.msra.mxu1 %v1362_v62 }
  0x71   :  { %1240 = vmatprep.subr.bf16.mxu1 %v1519_v43 }
  0x72   :  { %1188 = vmatpush3.bf16.msra.mxu0 %v1351_v52 }
  0x73   :  { %1189 = vmatprep.subr.bf16.mxu0 %v1352_v55  ;;  %v1115_v55 = vld [vmem:[%s1653_s6] ss:$0 sm:$0xff]  ;;  %s1484_s6 = scalar_lea.vmem %s1038_s17, 128 }
  0x74   :  { %1241 = vmatpush3.bf16.msra.mxu1 %v1363_v63  ;;  %v1124_v63 = vld [vmem:[%s1655_s8] ss:$0 sm:$0xff]  ;;  %p1485_p11 = scmp.ne.s32.totalorder %s1038_s17, %s1484_s6  ;;  %p1490_p13 = scmp.lt.s32.totalorder %s1484_s6, %s1484_s6 }
  0x75   :  { %1242 = vmatprep.subr.bf16.mxu1 %v1519_v43 }
  0x76   :  { %1190 = vmatpush3.bf16.msra.mxu0 %v1353_v56  ;;  %p1491_p0 = por %p1490_p13, %p1489_p12 }
  0x77   :  { %1191 = vmatprep.subr.bf16.mxu0 %v1354_v57 }
  0x78   :  { %1243 = vmatpush3.bf16.msra.mxu1 %v1364_v0  ;;  %p1492_p1 = pnand %p1491_p0, %p1485_p11 }
  0x79   :  { %1244 = vmatprep.subr.bf16.mxu1 %v1519_v43 }
  0x7a   :  { %1192 = vmatpush3.bf16.msra.mxu0 %v1355_v58 }
  0x7b   :  { %1254 = vmatprep.subr.bf16.mxu0 %v1519_v43 }
  0x7c   :  { %1245 = vmatpush3.bf16.msra.mxu1 %v1365_v1 }
  0x7d   :  { %644 = vmatmul.mubr.bf16.vlgmr.msra.gmra.mxu0 %v1053_v59  ;;  %1246 = vmatprep.subr.bf16.mxu1 %v1519_v43 }
  0x7e   :  { %1270 = vmatprep.mubr.msk.bf16.mxu0 %vm1520_vm0, %v1519_v43  ;;  %1255 = vmatpush3.bf16.msra.mxu0 %v1368_v4 }
  0x7f   :  { %1256 = vmatprep.subr.bf16.mxu0 %v1519_v43 }
  0x80   :  { %1247 = vmatpush3.bf16.msra.mxu1 %v1366_v2 }
  0x81   :  { %1248 = vmatprep.subr.bf16.mxu1 %v1519_v43 }
  0x82   :  { %1257 = vmatpush3.bf16.msra.mxu0 %v1369_v5 }
  0x83   :  { %1258 = vmatprep.subr.bf16.mxu0 %v1519_v43 }
  0x84   :  { %1249 = vmatpush3.bf16.msra.mxu1 %v1367_v3 }
  0x85   :  { %1274 = vmatprep.subr.bf16.mxu1 %v1519_v43 }
  0x86   :  { %1259 = vmatpush3.bf16.msra.mxu0 %v1370_v6 }
  0x87   :  { %1260 = vmatprep.subr.bf16.mxu0 %v1519_v43 }
  0x8a   :  { %1261 = vmatpush3.bf16.msra.mxu0 %v1371_v7 }
  0x8b   :  { %1262 = vmatprep.subr.bf16.mxu0 %v1519_v43 }
  0x8e   :  { %1263 = vmatpush3.bf16.msra.mxu0 %v1372_v8 }
  0x8f   :  { %1264 = vmatprep.subr.bf16.mxu0 %v1519_v43 }
  0x92   :  { %1265 = vmatpush3.bf16.msra.mxu0 %v1373_v9 }
  0x93   :  { %1266 = vmatprep.subr.bf16.mxu0 %v1519_v43 }
  0x96   :  { %1267 = vmatpush3.bf16.msra.mxu0 %v1374_v36 }
  0x97   :  { %1268 = vmatprep.subr.bf16.mxu0 %v1519_v43 }
  0x9a   :  { %1269 = vmatpush3.bf16.msra.mxu0 %v1375_v37 }
 0x11d   :  { %v1149_v10 = vpop.f32.mrf.mxu0 }
 0x11f   :  { %v1150_v11 = vpop.f32.mrf.mxu0  ;;  %v1171_v12 = vpop.f32.mrf.mxu1 }
 0x120   :  { %v1151_v22 = vadd.f32 %v1150_v11, %v1149_v10 }
 0x121   :  { %v1152_v13 = vpop.f32.mrf.mxu0  ;;  %v1172_v14 = vpop.f32.mrf.mxu1 }
 0x122   :  { %v566_v24 = vadd.f32 %v1151_v22, %v1048_v23  ;;  %v1173_v25 = vadd.f32 %v1172_v14, %v1171_v12 }
 0x123   :  { %v1153_v15 = vpop.f32.mrf.mxu0  ;;  %v1174_v16 = vpop.f32.mrf.mxu1 }
 0x124   :  { %v606_v28 = vadd.f32 %v1173_v25, %v566_v24 }
 0x125   :  { %v1175_v17 = vpop.f32.mrf.mxu1 }
 0x127   :  { %v685_v18 = vpop.f32.mrf.mxu1 }
 0x129   :  { %v1232_v19 = vpop.f32.mrf.mxu1 }
 0x12b   :  { %v688_v20 = vpop.f32.mrf.mxu1 }
 0x12d   :  { %v1233_v21 = vpop.f32.mrf.mxu1 }
 0x13d   :  { %v1193_v26 = vpop.f32.mrf.mxu0 }
 0x13f   :  { %v1194_v27 = vpop.f32.mrf.mxu0 }
 0x140   :  { %v1195_v29 = vadd.f32 %v1194_v27, %v1193_v26 }
 0x141   :  { %v1196_v30 = vpop.f32.mrf.mxu0 }
 0x142   :  { %v646_v31 = vadd.f32 %v1195_v29, %v606_v28 }
 0x143   :  { %v1197_v32 = vpop.f32.mrf.mxu0 }
 0x144   :  { %v686_v33 = vadd.f32 %v685_v18, %v646_v31 }
 0x146   :  { %v691_v34 = vmax.f32 %v686_v33, 0.0 }
 0x148   :  { %v692_v35 = vpack.c.bf16 %v691_v34, %v691_v34 }
 0x14a   :  { %1251 = vmatmul.mubr.bf16.vlgmr.msra.gmra.mxu1 %v692_v35 }
 0x14b   :  { %1290 = vmatprep.mubr.msk.bf16.mxu1 %vm1520_vm0, %v1519_v43  ;;  %1275 = vmatpush3.bf16.msra.mxu1 %v1376_v38 }
 0x14c   :  { %1276 = vmatprep.subr.bf16.mxu1 %v1519_v43 }
 0x14f   :  { %1277 = vmatpush3.bf16.msra.mxu1 %v1377_v39 }
 0x150   :  { %1278 = vmatprep.subr.bf16.mxu1 %v1519_v43 }
 0x153   :  { %1279 = vmatpush3.bf16.msra.mxu1 %v1378_v40 }
 0x154   :  { %1280 = vmatprep.subr.bf16.mxu1 %v1519_v43 }
 0x157   :  { %1281 = vmatpush3.bf16.msra.mxu1 %v1379_v41 }
 0x158   :  { %1282 = vmatprep.subr.bf16.mxu1 %v1519_v43 }
 0x15b   :  { %1283 = vmatpush3.bf16.msra.mxu1 %v1380_v42 }
 0x15c   :  { %1284 = vmatprep.subr.bf16.mxu1 %v1519_v43 }
 0x15f   :  { %1285 = vmatpush3.bf16.msra.mxu1 %v1381_v44 }
 0x160   :  { %1286 = vmatprep.subr.bf16.mxu1 %v1519_v43 }
 0x163   :  { %1287 = vmatpush3.bf16.msra.mxu1 %v1382_v53 }
 0x164   :  { %1288 = vmatprep.subr.bf16.mxu1 %v1519_v43 }
 0x167   :  { %1289 = vmatpush3.bf16.msra.mxu1 %v1383_v54 }
 0x20a   :  { %v798_v46 = vpop.f32.mrf.mxu1 }
 0x20b   :  { %v799_v47 = vadd.f32 %v1106_v45, %v798_v46 }
 0x20c   :  { %v1252_v48 = vpop.f32.mrf.mxu1 }
 0x20d   :  { %v804_v49 = vmax.f32 %v799_v47, 0.0 }
 0x20e   :  { %v801_v50 = vpop.f32.mrf.mxu1 }
 0x20f   :  { %v805_v51 = vpack.c.bf16 %v804_v49, %v804_v49 }
 0x210   :  { %v1253_v52 = vpop.f32.mrf.mxu1 }
 0x211   :  { %1271 = vmatmul.mubr.bf16.vlgmr.msra.gmra.mxu0 %v805_v51 }
 0x2d1   :  { %v911_v56 = vpop.f32.mrf.mxu0 }
 0x2d2   :  { %v912_v57 = vadd.f32 %v1115_v55, %v911_v56 }
 0x2d3   :  { %v1272_v58 = vpop.f32.mrf.mxu0 }
 0x2d4   :  { %v917_v59 = vmax.f32 %v912_v57, 0.0 }
 0x2d5   :  { %v914_v60 = vpop.f32.mrf.mxu0 }
 0x2d6   :  { %v918_v61 = vpack.c.bf16 %v917_v59, %v917_v59 }
 0x2d7   :  { %v1273_v62 = vpop.f32.mrf.mxu0 }
 0x2d8   :  { %1291 = vmatmul.mubr.bf16.vlgmr.msra.gmra.mxu1 %v918_v61 }
 0x398   :  { %v1024_v43 = vpop.f32.mrf.mxu1 }
 0x399   :  { %v1025_v0 = vadd.f32 %v1124_v63, %v1024_v43 }
 0x39a   :  { %v1292_v1 = vpop.f32.mrf.mxu1 }
 0x39b   :  { %1030 = vst [vmem:[#allocation11] sm:$0xff] %v1025_v0 }
 0x39c   :  { %v1027_v2 = vpop.f32.mrf.mxu1 }
 0x39d   :  { %1495 = shalt.err (!%p1492_p1)
}
 0x39e   :  { %1040 = dma.vmem_to_hbm [thread:$0]  %s1038_s17, 128, %s1656_s9, [#allocation4]   ;;  %v1293_v3 = vpop.f32.mrf.mxu1 }
 0x39f   :  { %1510 = dma.done.wait [#allocation4], 128  }
 0x3a0   :  { %1511 = vsyncadd [#allocation4], 4294967168 }
 0x3a1   :  { %1044 = vsyncpa [#allocation3], 1 }
 0x3a2   :  { %1045 = vsyncpa [#allocation6], 1 }
 0x3a3   :  { %1046 = vsyncpa [#allocation9], 1 }
 0x3a4   :  { %1047 = vsyncpa [#allocation4], 1 }

</bundles_post_ra>
